<compile_context>
chip_gen: v7x
topology: tpu7x:2x2x1
jax: 0.10.0
libtpu: 0.0.40
codegen_flags: <defaults>
</compile_context>

<pallas_src>
import functools

import jax
import jax.numpy as jnp
from jax.experimental import pallas as pl

# ---- model configuration (small shapes consistent with the module) ----------
BS = 2           # batch size
N_NODES = 16     # num_nodes (genes)
N_FEAT = 8       # n_features
HID_GCN = 16     # hidden_gcn
NUM_LAYERS = 2   # num_layers -> conv1 + one extra SAGEConv
N_CMT = 8        # n_cmt (number of pathways)
HID_FC = 32      # hidden_fc
N_CLASSES = 4    # n_classes


# ---- fused Pallas kernel: convs + pathway pool + fc/lin1/lin2 + log_softmax --
def _fused_sage_kernel(*refs, bs, num_layers):
    # inputs: x, a, (wc, bc) * num_layers, wfc, q, beff, w2t, b2 | output: o
    x_ref, a_ref = refs[0], refs[1]
    conv_refs = refs[2:2 + 2 * num_layers]
    wfc_ref, q_ref, beff_ref, w2t_ref, b2_ref, o_ref = refs[2 + 2 * num_layers:]

    a = a_ref[...]                      # (N, N)   mean-aggregation operator
    wfc = wfc_ref[...]                  # (1, L*H) fc weights (concat layout)
    q = q_ref[...]                      # (N, HFC) pathway-mean + lin1 fold
    beff = beff_ref[...]                # (1, HFC) folded fc/lin1 bias

    pre_rows = []
    for b in range(bs):                 # static unroll over the tiny batch
        h = x_ref[b]                    # (N, Fin)
        feats = []
        for l in range(num_layers):     # SAGEConv + ReLU, one matmul per layer
            wc = conv_refs[2 * l][...]          # (2*Fin_l, H) = [Wr^T ; Wl^T]
            bc = conv_refs[2 * l + 1][...]      # (1, H)
            t = jnp.concatenate(
                [h, jnp.dot(a, h, preferred_element_type=jnp.float32)], axis=-1)
            h = jnp.maximum(
                jnp.dot(t, wc, preferred_element_type=jnp.float32) + bc, 0.0)
            feats.append(h)
        xcat = jnp.concatenate(feats, axis=-1)            # (N, L*H), mode='cat'
        # fc (permuted to concat layout), pathway scatter_mean and lin1 are all
        # linear -> folded into wfc / q / beff at init (exact in eval mode).
        z = jnp.sum(xcat * wfc, axis=-1, keepdims=True)             # (N, 1)
        pre_rows.append(jnp.sum(z * q, axis=0, keepdims=True) + beff)  # (1,HFC)
    pre = jnp.concatenate(pre_rows, axis=0)               # (bs, HFC) == lin1(g)

    hid = jnp.maximum(pre, 0.0)                           # relu; dropout = id
    logits = jnp.dot(hid, w2t_ref[...],
                     preferred_element_type=jnp.float32) + b2_ref[...]
    m = jnp.max(logits, axis=-1, keepdims=True)
    lse = m + jnp.log(jnp.sum(jnp.exp(logits - m), axis=-1, keepdims=True))
    o_ref[...] = logits - lse                             # log_softmax(-1)


def sage_forward(fused, x):
    bs = x.shape[0]
    num_layers = len(fused["convs"])
    conv_flat = []
    for wc, bc in fused["convs"]:
        conv_flat.extend([wc, bc])
    kernel = functools.partial(_fused_sage_kernel, bs=bs, num_layers=num_layers)
    n_classes = fused["w2t"].shape[1]
    # No grid, no index_maps: every operand is one full block kept VMEM-resident
    # for the whole forward; only the (bs, n_classes) result is written to HBM.
    return pl.pallas_call(
        kernel,
        out_shape=jax.ShapeDtypeStruct((bs, n_classes), jnp.float32),
    )(x, fused["a"], *conv_flat, fused["wfc"], fused["q"], fused["beff"],
      fused["w2t"], fused["b2"])


# ---- one-time dense operators (sparse scatters done on the host, at init) ----
def build_dense_operators(edge_index, pathway_row, pathway_col, num_nodes, n_cmt):
    # SAGEConv mean aggregation: A[i, j] = 1/in_deg(i) for each edge j -> i.
    src, dst = edge_index[0], edge_index[1]
    deg = jnp.zeros((num_nodes,), jnp.float32).at[dst].add(1.0)
    inv = jnp.where(deg > 0, 1.0 / deg, 0.0)
    a = jnp.zeros((num_nodes, num_nodes), jnp.float32).at[dst, src].add(1.0)
    a = a * inv[:, None]
    # pathway pooling: scatter_mean(x[row], col, dim=0) == P @ x.
    cnt = jnp.zeros((n_cmt,), jnp.float32).at[pathway_col].add(1.0)
    p = jnp.zeros((n_cmt, num_nodes), jnp.float32)
    p = p.at[pathway_col, pathway_row].add(1.0)
    p = p / jnp.maximum(cnt, 1.0)[:, None]
    return a, p


# ---- deterministic parameters in the original torch layout -------------------
def init_params(key):
    ks = jax.random.split(key, 12)

    def lin(k, fan_in, shape):
        bound = 1.0 / jnp.sqrt(jnp.float32(fan_in))
        return jax.random.uniform(k, shape, jnp.float32, -bound, bound)

    params = {}
    # SAGEConv: lin_l (neighbors, with bias), lin_r (root, no bias); (out, in).
    params["conv1"] = dict(wl=lin(ks[0], N_FEAT, (HID_GCN, N_FEAT)),
                           bl=lin(ks[1], N_FEAT, (HID_GCN,)),
                           wr=lin(ks[2], N_FEAT, (HID_GCN, N_FEAT)))
    params["convs"] = []
    for i in range(NUM_LAYERS - 1):
        params["convs"].append(dict(
            wl=lin(ks[3 + 3 * i], HID_GCN, (HID_GCN, HID_GCN)),
            bl=lin(ks[4 + 3 * i], HID_GCN, (HID_GCN,)),
            wr=lin(ks[5 + 3 * i], HID_GCN, (HID_GCN, HID_GCN))))
    lh = NUM_LAYERS * HID_GCN
    params["fc_w"] = lin(ks[6], lh, (1, lh))                 # fc: (L*H) -> 1
    params["fc_b"] = lin(ks[7], lh, (1,))
    params["lin1_w"] = lin(ks[8], N_CMT, (HID_FC, N_CMT))    # lin1: n_cmt -> HFC
    params["lin1_b"] = lin(ks[9], N_CMT, (HID_FC,))
    params["lin2_w"] = lin(ks[10], HID_FC, (N_CLASSES, HID_FC))
    params["lin2_b"] = lin(ks[11], HID_FC, (N_CLASSES,))
    return params


def fuse_params(params, a, p):
    """One-time (init) fold of everything the kernel would otherwise redo."""
    def cat_conv(c):
        # concat([x, A@x], -1) @ [Wr^T ; Wl^T] == x @ Wr^T + (A@x) @ Wl^T
        return (jnp.concatenate([c["wr"].T, c["wl"].T], axis=0), c["bl"][None, :])

    convs = [cat_conv(params["conv1"])] + [cat_conv(c) for c in params["convs"]]
    lh = NUM_LAYERS * HID_GCN
    # torch.stack(xs,-1).view(...) interleave (hidden outer, layer inner) is
    # absorbed into a permutation of the fc weights so the kernel uses a plain
    # lane-contiguous concat([h1, h2], -1):
    wfc = params["fc_w"][0].reshape(HID_GCN, NUM_LAYERS).T.reshape(1, lh)
    # pathway scatter_mean (P), fc bias and lin1 are consecutive linear maps
    # (dropout is identity in eval mode) -> exact fold into Q / beff:
    w1t = params["lin1_w"].T                                  # (n_cmt, HFC)
    q = jnp.dot(p.T, w1t)                                     # (N, HFC)
    beff = (params["lin1_b"] + params["fc_b"][0] * jnp.sum(w1t, axis=0))[None, :]
    return dict(a=a, convs=convs, wfc=wfc, q=q, beff=beff,
                w2t=params["lin2_w"].T, b2=params["lin2_b"][None, :])


# ---- pure-JAX reference (unfused, mirrors the torch module) -------------------
def reference_forward(params, a, p, x):
    def sage(h, c):
        agg = jnp.einsum("ij,bjf->bif", a, h)
        return jax.nn.relu(agg @ c["wl"].T + c["bl"] + h @ c["wr"].T)

    h = sage(x, params["conv1"])
    xs = [h]
    for c in params["convs"]:
        h = sage(h, c)
        xs.append(h)
    xcat = jnp.stack(xs, axis=-1).reshape(x.shape[0], x.shape[1], -1)
    pf = jnp.einsum("cg,bgf->bcf", p, xcat)                  # scatter_mean
    g = pf @ params["fc_w"][0] + params["fc_b"][0]           # fc -> (bs, n_cmt)
    hid = jax.nn.relu(g @ params["lin1_w"].T + params["lin1_b"])
    logits = hid @ params["lin2_w"].T + params["lin2_b"]
    return jax.nn.log_softmax(logits, axis=-1)


if __name__ == "__main__":
    key = jax.random.PRNGKey(0)
    kx, kp = jax.random.split(key)
    x = jax.random.normal(kx, (BS, N_NODES, N_FEAT), jnp.float32)

    # undirected ring graph over the genes (both edge directions)
    nodes = jnp.arange(N_NODES, dtype=jnp.int32)
    nxt = (nodes + 1) % N_NODES
    edge_index = jnp.stack(
        [jnp.concatenate([nodes, nxt]), jnp.concatenate([nxt, nodes])], axis=0)

    # pathway membership: pathway c contains genes {2c, 2c+1, 2c+2, 2c+3} mod N
    pathway_row = jnp.concatenate([nodes, (nodes + 2) % N_NODES])
    pathway_col = jnp.concatenate([nodes // 2, nodes // 2])

    a, p = build_dense_operators(edge_index, pathway_row, pathway_col,
                                 N_NODES, N_CMT)
    params = init_params(kp)
    fused = fuse_params(params, a, p)        # hoisted: computed once at init

    forward = jax.jit(sage_forward)
    out = forward(fused, x)                  # (BS, N_CLASSES) log-probabilities
    jax.block_until_ready(out)

    ref = reference_forward(params, a, p, x)
    assert out.shape == (BS, N_CLASSES)
    assert bool(jnp.all(jnp.isfinite(out)))
    assert bool(jnp.allclose(out, ref, atol=1e-4, rtol=1e-4))
    print("KERNEL_OK")
</pallas_src>

<mosaic_0001>
module attributes {stable_mosaic.version = 11 : i64} {
  func.func @_fused_sage_kernel(%arg0: memref<2x16x8xf32, #tpu.memory_space<vmem>>, %arg1: memref<16x16xf32, #tpu.memory_space<vmem>>, %arg2: memref<16x16xf32, #tpu.memory_space<vmem>>, %arg3: memref<1x16xf32, #tpu.memory_space<vmem>>, %arg4: memref<32x16xf32, #tpu.memory_space<vmem>>, %arg5: memref<1x16xf32, #tpu.memory_space<vmem>>, %arg6: memref<1x32xf32, #tpu.memory_space<vmem>>, %arg7: memref<16x32xf32, #tpu.memory_space<vmem>>, %arg8: memref<1x32xf32, #tpu.memory_space<vmem>>, %arg9: memref<32x4xf32, #tpu.memory_space<vmem>>, %arg10: memref<1x4xf32, #tpu.memory_space<vmem>>, %arg11: memref<2x4xf32, #tpu.memory_space<vmem>>) attributes {dimension_semantics = [], scalar_prefetch = 0 : i64, scratch_operands = 0 : i64, tpu.core_type = #tpu.core_type<tc>} {
    %c0 = arith.constant 0 : index
    %c0_0 = arith.constant 0 : index
    %0 = vector.load %arg1[%c0, %c0_0] : memref<16x16xf32, #tpu.memory_space<vmem>>, vector<16x16xf32>
    %c0_1 = arith.constant 0 : index
    %c0_2 = arith.constant 0 : index
    %1 = vector.load %arg6[%c0_1, %c0_2] : memref<1x32xf32, #tpu.memory_space<vmem>>, vector<1x32xf32>
    %c0_3 = arith.constant 0 : index
    %c0_4 = arith.constant 0 : index
    %2 = vector.load %arg7[%c0_3, %c0_4] : memref<16x32xf32, #tpu.memory_space<vmem>>, vector<16x32xf32>
    %c0_5 = arith.constant 0 : index
    %c0_6 = arith.constant 0 : index
    %3 = vector.load %arg8[%c0_5, %c0_6] : memref<1x32xf32, #tpu.memory_space<vmem>>, vector<1x32xf32>
    %c0_7 = arith.constant 0 : index
    %c0_8 = arith.constant 0 : index
    %c0_9 = arith.constant 0 : index
    %4 = vector.load %arg0[%c0_7, %c0_8, %c0_9] : memref<2x16x8xf32, #tpu.memory_space<vmem>>, vector<1x16x8xf32>
    %5 = vector.shape_cast %4 : vector<1x16x8xf32> to vector<16x8xf32>
    %c0_10 = arith.constant 0 : index
    %c0_11 = arith.constant 0 : index
    %6 = vector.load %arg2[%c0_10, %c0_11] : memref<16x16xf32, #tpu.memory_space<vmem>>, vector<16x16xf32>
    %c0_12 = arith.constant 0 : index
    %c0_13 = arith.constant 0 : index
    %7 = vector.load %arg3[%c0_12, %c0_13] : memref<1x16xf32, #tpu.memory_space<vmem>>, vector<1x16xf32>
    %cst = arith.constant dense<0.000000e+00> : vector<16x8xf32>
    %8 = tpu.matmul %0, %5, %cst {dimension_numbers = #tpu.dot_dimension_numbers<[1], [0], [0], [1], [0, 0, 1, 1], [], []>} : vector<16x16xf32>, vector<16x8xf32>, vector<16x8xf32> -> vector<16x8xf32>
    %9 = tpu.concatenate %5, %8 in 1 : vector<16x8xf32>, vector<16x8xf32> -> vector<16x16xf32>
    %cst_14 = arith.constant dense<0.000000e+00> : vector<16x16xf32>
    %10 = tpu.matmul %9, %6, %cst_14 {dimension_numbers = #tpu.dot_dimension_numbers<[1], [0], [0], [1], [0, 0, 1, 1], [], []>} : vector<16x16xf32>, vector<16x16xf32>, vector<16x16xf32> -> vector<16x16xf32>
    %11 = vector.broadcast %7 : vector<1x16xf32> to vector<16x16xf32>
    %12 = arith.addf %10, %11 : vector<16x16xf32>
    %cst_15 = arith.constant 0.000000e+00 : f32
    %13 = vector.broadcast %cst_15 : f32 to vector<16x16xf32>
    %14 = arith.maximumf %12, %13 : vector<16x16xf32>
    %c0_16 = arith.constant 0 : index
    %c0_17 = arith.constant 0 : index
    %15 = vector.load %arg4[%c0_16, %c0_17] : memref<32x16xf32, #tpu.memory_space<vmem>>, vector<32x16xf32>
    %c0_18 = arith.constant 0 : index
    %c0_19 = arith.constant 0 : index
    %16 = vector.load %arg5[%c0_18, %c0_19] : memref<1x16xf32, #tpu.memory_space<vmem>>, vector<1x16xf32>
    %cst_20 = arith.constant dense<0.000000e+00> : vector<16x16xf32>
    %17 = tpu.matmul %0, %14, %cst_20 {dimension_numbers = #tpu.dot_dimension_numbers<[1], [0], [0], [1], [0, 0, 1, 1], [], []>} : vector<16x16xf32>, vector<16x16xf32>, vector<16x16xf32> -> vector<16x16xf32>
    %18 = tpu.concatenate %14, %17 in 1 : vector<16x16xf32>, vector<16x16xf32> -> vector<16x32xf32>
    %cst_21 = arith.constant dense<0.000000e+00> : vector<16x16xf32>
    %19 = tpu.matmul %18, %15, %cst_21 {dimension_numbers = #tpu.dot_dimension_numbers<[1], [0], [0], [1], [0, 0, 1, 1], [], []>} : vector<16x32xf32>, vector<32x16xf32>, vector<16x16xf32> -> vector<16x16xf32>
    %20 = vector.broadcast %16 : vector<1x16xf32> to vector<16x16xf32>
    %21 = arith.addf %19, %20 : vector<16x16xf32>
    %cst_22 = arith.constant 0.000000e+00 : f32
    %22 = vector.broadcast %cst_22 : f32 to vector<16x16xf32>
    %23 = arith.maximumf %21, %22 : vector<16x16xf32>
    %24 = tpu.concatenate %14, %23 in 1 : vector<16x16xf32>, vector<16x16xf32> -> vector<16x32xf32>
    %25 = vector.broadcast %1 : vector<1x32xf32> to vector<16x32xf32>
    %26 = arith.mulf %24, %25 : vector<16x32xf32>
    %cst_23 = arith.constant dense<0.000000e+00> : vector<16xf32>
    %27 = vector.multi_reduction <add>, %26, %cst_23 [1] : vector<16x32xf32> to vector<16xf32>
    %28 = vector.shape_cast %27 : vector<16xf32> to vector<16x1xf32>
    %29 = vector.broadcast %28 : vector<16x1xf32> to vector<16x32xf32>
    %30 = arith.mulf %29, %2 : vector<16x32xf32>
    %cst_24 = arith.constant dense<0.000000e+00> : vector<32xf32>
    %31 = vector.multi_reduction <add>, %30, %cst_24 [0] : vector<16x32xf32> to vector<32xf32>
    %32 = vector.shape_cast %31 : vector<32xf32> to vector<1x32xf32>
    %33 = arith.addf %32, %3 : vector<1x32xf32>
    %c1 = arith.constant 1 : index
    %c0_25 = arith.constant 0 : index
    %c0_26 = arith.constant 0 : index
    %34 = vector.load %arg0[%c1, %c0_25, %c0_26] : memref<2x16x8xf32, #tpu.memory_space<vmem>>, vector<1x16x8xf32>
    %35 = vector.shape_cast %34 : vector<1x16x8xf32> to vector<16x8xf32>
    %c0_27 = arith.constant 0 : index
    %c0_28 = arith.constant 0 : index
    %36 = vector.load %arg2[%c0_27, %c0_28] : memref<16x16xf32, #tpu.memory_space<vmem>>, vector<16x16xf32>
    %c0_29 = arith.constant 0 : index
    %c0_30 = arith.constant 0 : index
    %37 = vector.load %arg3[%c0_29, %c0_30] : memref<1x16xf32, #tpu.memory_space<vmem>>, vector<1x16xf32>
    %cst_31 = arith.constant dense<0.000000e+00> : vector<16x8xf32>
    %38 = tpu.matmul %0, %35, %cst_31 {dimension_numbers = #tpu.dot_dimension_numbers<[1], [0], [0], [1], [0, 0, 1, 1], [], []>} : vector<16x16xf32>, vector<16x8xf32>, vector<16x8xf32> -> vector<16x8xf32>
    %39 = tpu.concatenate %35, %38 in 1 : vector<16x8xf32>, vector<16x8xf32> -> vector<16x16xf32>
    %cst_32 = arith.constant dense<0.000000e+00> : vector<16x16xf32>
    %40 = tpu.matmul %39, %36, %cst_32 {dimension_numbers = #tpu.dot_dimension_numbers<[1], [0], [0], [1], [0, 0, 1, 1], [], []>} : vector<16x16xf32>, vector<16x16xf32>, vector<16x16xf32> -> vector<16x16xf32>
    %41 = vector.broadcast %37 : vector<1x16xf32> to vector<16x16xf32>
    %42 = arith.addf %40, %41 : vector<16x16xf32>
    %cst_33 = arith.constant 0.000000e+00 : f32
    %43 = vector.broadcast %cst_33 : f32 to vector<16x16xf32>
    %44 = arith.maximumf %42, %43 : vector<16x16xf32>
    %c0_34 = arith.constant 0 : index
    %c0_35 = arith.constant 0 : index
    %45 = vector.load %arg4[%c0_34, %c0_35] : memref<32x16xf32, #tpu.memory_space<vmem>>, vector<32x16xf32>
    %c0_36 = arith.constant 0 : index
    %c0_37 = arith.constant 0 : index
    %46 = vector.load %arg5[%c0_36, %c0_37] : memref<1x16xf32, #tpu.memory_space<vmem>>, vector<1x16xf32>
    %cst_38 = arith.constant dense<0.000000e+00> : vector<16x16xf32>
    %47 = tpu.matmul %0, %44, %cst_38 {dimension_numbers = #tpu.dot_dimension_numbers<[1], [0], [0], [1], [0, 0, 1, 1], [], []>} : vector<16x16xf32>, vector<16x16xf32>, vector<16x16xf32> -> vector<16x16xf32>
    %48 = tpu.concatenate %44, %47 in 1 : vector<16x16xf32>, vector<16x16xf32> -> vector<16x32xf32>
    %cst_39 = arith.constant dense<0.000000e+00> : vector<16x16xf32>
    %49 = tpu.matmul %48, %45, %cst_39 {dimension_numbers = #tpu.dot_dimension_numbers<[1], [0], [0], [1], [0, 0, 1, 1], [], []>} : vector<16x32xf32>, vector<32x16xf32>, vector<16x16xf32> -> vector<16x16xf32>
    %50 = vector.broadcast %46 : vector<1x16xf32> to vector<16x16xf32>
    %51 = arith.addf %49, %50 : vector<16x16xf32>
    %cst_40 = arith.constant 0.000000e+00 : f32
    %52 = vector.broadcast %cst_40 : f32 to vector<16x16xf32>
    %53 = arith.maximumf %51, %52 : vector<16x16xf32>
    %54 = tpu.concatenate %44, %53 in 1 : vector<16x16xf32>, vector<16x16xf32> -> vector<16x32xf32>
    %55 = vector.broadcast %1 : vector<1x32xf32> to vector<16x32xf32>
    %56 = arith.mulf %54, %55 : vector<16x32xf32>
    %cst_41 = arith.constant dense<0.000000e+00> : vector<16xf32>
    %57 = vector.multi_reduction <add>, %56, %cst_41 [1] : vector<16x32xf32> to vector<16xf32>
    %58 = vector.shape_cast %57 : vector<16xf32> to vector<16x1xf32>
    %59 = vector.broadcast %58 : vector<16x1xf32> to vector<16x32xf32>
    %60 = arith.mulf %59, %2 : vector<16x32xf32>
    %cst_42 = arith.constant dense<0.000000e+00> : vector<32xf32>
    %61 = vector.multi_reduction <add>, %60, %cst_42 [0] : vector<16x32xf32> to vector<32xf32>
    %62 = vector.shape_cast %61 : vector<32xf32> to vector<1x32xf32>
    %63 = arith.addf %62, %3 : vector<1x32xf32>
    %64 = tpu.concatenate %33, %63 in 0 : vector<1x32xf32>, vector<1x32xf32> -> vector<2x32xf32>
    %cst_43 = arith.constant 0.000000e+00 : f32
    %65 = vector.broadcast %cst_43 : f32 to vector<2x32xf32>
    %66 = arith.maximumf %64, %65 : vector<2x32xf32>
    %c0_44 = arith.constant 0 : index
    %c0_45 = arith.constant 0 : index
    %67 = vector.load %arg9[%c0_44, %c0_45] : memref<32x4xf32, #tpu.memory_space<vmem>>, vector<32x4xf32>
    %cst_46 = arith.constant dense<0.000000e+00> : vector<2x4xf32>
    %68 = tpu.matmul %66, %67, %cst_46 {dimension_numbers = #tpu.dot_dimension_numbers<[1], [0], [0], [1], [0, 0, 1, 1], [], []>} : vector<2x32xf32>, vector<32x4xf32>, vector<2x4xf32> -> vector<2x4xf32>
    %c0_47 = arith.constant 0 : index
    %c0_48 = arith.constant 0 : index
    %69 = vector.load %arg10[%c0_47, %c0_48] : memref<1x4xf32, #tpu.memory_space<vmem>>, vector<1x4xf32>
    %70 = vector.broadcast %69 : vector<1x4xf32> to vector<2x4xf32>
    %71 = arith.addf %68, %70 : vector<2x4xf32>
    %cst_49 = arith.constant dense<0xFF800000> : vector<2xf32>
    %72 = vector.multi_reduction <maximumf>, %71, %cst_49 [1] : vector<2x4xf32> to vector<2xf32>
    %73 = vector.shape_cast %72 : vector<2xf32> to vector<2x1xf32>
    %74 = vector.broadcast %73 : vector<2x1xf32> to vector<2x4xf32>
    %75 = arith.subf %71, %74 : vector<2x4xf32>
    %76 = math.exp %75 : vector<2x4xf32>
    %cst_50 = arith.constant dense<0.000000e+00> : vector<2xf32>
    %77 = vector.multi_reduction <add>, %76, %cst_50 [1] : vector<2x4xf32> to vector<2xf32>
    %78 = vector.shape_cast %77 : vector<2xf32> to vector<2x1xf32>
    %79 = math.log %78 : vector<2x1xf32>
    %80 = arith.addf %73, %79 : vector<2x1xf32>
    %81 = vector.broadcast %80 : vector<2x1xf32> to vector<2x4xf32>
    %82 = arith.subf %71, %81 : vector<2x4xf32>
    %c0_51 = arith.constant 0 : index
    %c0_52 = arith.constant 0 : index
    %83 = vector.load %arg11[%c0_51, %c0_52] : memref<2x4xf32, #tpu.memory_space<vmem>>, vector<2x4xf32>
    tpu.vector_store %arg11[%c0_51, %c0_52], %82 {strides = array<i32>} : memref<2x4xf32, #tpu.memory_space<vmem>>, vector<2x4xf32>,
    return
  }
}

</mosaic_0001>

<bundles_post_ra>
// kernel: sage_forward.1
= control target key start
LH: loop header
LB: loop body
LE: loop exit
PB: predicated region body
PF: predicated region fallthrough
CT: control target
= control target key end

     0   :  { %vm50_vm0 = vcmask 130048   ;;  %s1376_s0 = inlined_call_operand.vmem [shape: f32[2,16,8], index: 0, kind: input, shape index: {}]   ;;  %s1377_s1 = inlined_call_operand.vmem [shape: f32[16,16], index: 1, kind: input, shape index: {}]   ;;  %s1378_s2 = inlined_call_operand.vmem [shape: f32[16,16], index: 2, kind: input, shape index: {}]   ;;  %s1379_s3 = inlined_call_operand.vmem [shape: f32[1,16], index: 3, kind: input, shape index: {}]   ;;  %s1380_s4 = inlined_call_operand.vmem [shape: f32[32,16], index: 4, kind: input, shape index: {}]   ;;  %s1381_s5 = inlined_call_operand.vmem [shape: f32[1,16], index: 5, kind: input, shape index: {}]   ;;  %s1382_s6 = inlined_call_operand.vmem [shape: f32[1,32], index: 6, kind: input, shape index: {}]   ;;  %s1383_s7 = inlined_call_operand.vmem [shape: f32[16,32], index: 7, kind: input, shape index: {}]   ;;  %s1384_s8 = inlined_call_operand.vmem [shape: f32[1,32], index: 8, kind: input, shape index: {}]   ;;  %s1385_s9 = inlined_call_operand.vmem [shape: f32[32,4], index: 9, kind: input, shape index: {}]   ;;  %s1386_s10 = inlined_call_operand.vmem [shape: f32[1,4], index: 10, kind: input, shape index: {}]   ;;  %s1387_s11 = inlined_call_operand.hbm [shape: f32[2,4], index: 11, kind: output, shape index: {}]  }
   0x1   :  { %v45_v0 = vld [vmem:[%s1376_s0] sm:$0xff]  ;;  %v46_v1 = vld [vmem:[%s1376_s0 + $0x8] sm:$0xff] }
   0x2   :  { %v1230_v2 = vld [vmem:[%s1377_s1] sm:$0xff]  ;;  %v1075_v3 = vpack.c.bf16 %v46_v1, %v45_v0 }
   0x3   :  { %1004 = vmatprep.mubr.msk.f32.mxu0 %vm50_vm0, %v1230_v2 }
   0x4   :  { %16 = vsyncpa [#allocation3], 0  ;;  %1076 = vmatprep.subr.bf16.mxu0 %v1075_v3  ;;  %v1237_v4 = vld [vmem:[%s1377_s1 + $0x8] sm:$0xff]  ;;  %v47_v5 = vld [vmem:[%s1378_s2] sm:$0xff]  ;;  %s1155_s1 = smov 8   ;;  %vm140_vm1 = vcmask 64512  }
   0x5   :  { %1078 = vmatpush3.bf16.msra.mxu0 %v1075_v3  ;;  %v48_v6 = vld [vmem:[%s1378_s2 + $0x8] sm:$0xff]  ;;  %v938_v14 = vld [vmem:[%s1379_s3] ss:$0 sm:$0xff]  ;;  %v947_v20 = vld [vmem:[%s1376_s0 + $0x10] sm:$0xff]  ;;  %s1156_s21 = smov 16   ;;  %vm328_vm2 = vcmask 261120  }
   0x6   :  { %v1079_v7 = vpack.c.bf16 %v48_v6, %v47_v5  ;;  %v948_v21 = vld [vmem:[%s1376_s0 + $0x18] sm:$0xff]  ;;  %v232_v25 = vld [vmem:[%s1380_s4] sm:$0xff]  ;;  %v233_v26 = vld [vmem:[%s1380_s4 + $0x8] sm:$0xff]  ;;  %vm1158_vm3 = vmmov 0   ;;  %vm820_vm4 = vcmask 1040384   ;;  %vm907_vm5 = vcmask 25600  }
   0x7   :  { %v1095_v24 = vpack.c.bf16 %v948_v21, %v947_v20  ;;  %v1087_v27 = vpack.c.bf16 %v233_v26, %v232_v25  ;;  %v234_v28 = vld [vmem:[%s1380_s4 + $0x10] sm:$0xff]  ;;  %v235_v29 = vld [vmem:[%s1380_s4 + $0x18] sm:$0xff]  ;;  %v943_v58 = vld [vmem:[%s1381_s5] ss:$0 sm:$0xff]  ;;  %v1157_v26 = vmov 0.0|0.0  }
   0x8   :  { %1005 = vmatmul.mubr.msk.f32.vlgmr.msra.gmra.mrb[0].mxu0 %vm50_vm0, %v1237_v4  ;;  %1080 = vmatprep.subr.bf16.mxu1 %v1079_v7  ;;  %v1091_v30 = vpack.c.bf16 %v235_v29, %v234_v28  ;;  %v946_v5 = vld [vmem:[%s1382_s6] ss:$0 sm:$0xff]  ;;  %v1159_v29 = vmov 0.0  }
   0x9   :  { %1018 = vmatprep.mubr.msk.f32.mxu0 %vm50_vm0, %v1230_v2  ;;  %1082 = vmatpush3.bf16.msra.mxu1 %v1079_v7 }
   0xa   :  { %1088 = vmatprep.subr.bf16.mxu1 %v1087_v27 }
  0xdb   :  { %v1006_v8 = vpop.f32.mrb[0].mxu0 }
  0xdc   :  { %v123_v9 = vpop.f32.mrb[1].mxu0 }
  0xdd   :  { %134 = vrot.lane.b32.xlu0 %v123_v9, %s1155_s1 }
  0xe1   :  { %136 = vrot.lane.b32.xlu0 %v1006_v8, %s1155_s1 }
 0x14f   :  { %v135_v10 = vpop.permute.xlu0 %134 }
 0x150   :  { %v141_v11 = vsel %vm140_vm1, %v45_v0, %v135_v10 }
 0x151   :  { %1011 = vmatprep.mubr.msk.f32.mxu1 %vm50_vm0, %v141_v11 }
 0x153   :  { %v137_v12 = vpop.permute.xlu0 %136 }
 0x154   :  { %v142_v13 = vsel %vm140_vm1, %v46_v1, %v137_v12 }
 0x155   :  { %1012 = vmatmul.mubr.msk.f32.vlgmr.msra.gmra.mrb[0].mxu1 %vm50_vm0, %v142_v13 }
 0x156   :  { %1090 = vmatpush3.bf16.msra.mxu1 %v1087_v27 }
 0x157   :  { %1092 = vmatprep.subr.bf16.mxu1 %v1091_v30 }
 0x15a   :  { %1094 = vmatpush3.bf16.msra.mxu1 %v1091_v30 }
 0x228   :  { %v1013_v15 = vpop.f32.mrb[0].mxu1 }
 0x229   :  { %v227_v16 = vadd.f32 %v1013_v15, %v938_v14  ;;  %v221_v17 = vpop.f32.mrb[1].mxu1 }
 0x22a   :  { %v222_v18 = vadd.f32 %v938_v14, %v221_v17 }
 0x22b   :  { %v1258_v19 = vmax.f32 %v227_v16, 0.0 }
 0x22c   :  { %v1266_v22 = vmax.f32 %v222_v18, 0.0 }
 0x22e   :  { %v1083_v23 = vpack.c.bf16 %v1258_v19, %v1266_v22 }
 0x230   :  { %1084 = vmatprep.subr.bf16.mxu0 %v1083_v23 }
 0x231   :  { %1086 = vmatpush3.bf16.msra.mxu0 %v1083_v23 }
 0x232   :  { %1096 = vmatprep.subr.bf16.mxu0 %v1095_v24 }
 0x234   :  { %1019 = vmatmul.mubr.msk.f32.vlgmr.msra.gmra.mrb[2].mxu0 %vm50_vm0, %v1237_v4 }
 0x235   :  { %1098 = vmatpush3.bf16.msra.mxu0 %v1095_v24  ;;  %1036 = vmatprep.mubr.msk.f32.mxu0 %vm50_vm0, %v1230_v2  ;;  %v824_v24 = vld [vmem:[%s1385_s9 + $0x8] sm:$0xff] }
 0x236   :  { %1100 = vmatprep.subr.bf16.mxu0 %v1079_v7 }
 0x238   :  { %1037 = vmatmul.mubr.msk.f32.vlgmr.msra.gmra.mrb[4].mxu0 %vm50_vm0, %v1237_v4 }
 0x239   :  { %1102 = vmatpush3.bf16.msra.mxu0 %v1079_v7 }
 0x23a   :  { %1108 = vmatprep.subr.bf16.mxu0 %v1087_v27 }
 0x307   :  { %v1020_v31 = vpop.f32.mrb[2].mxu0 }
 0x308   :  { %v303_v32 = vpop.f32.mrb[3].mxu0 }
 0x309   :  { %314 = vrot.lane.b32.xlu0 %v303_v32, %s1156_s21 }
 0x30b   :  { %v1038_v33 = vpop.f32.mrb[4].mxu0 }
 0x30c   :  { %v517_v34 = vpop.f32.mrb[5].mxu0 }
 0x30d   :  { %528 = vrot.lane.b32.xlu1 %v517_v34, %s1155_s1  ;;  %v42_v34 = vld [vmem:[%s1383_s7] sm:$0xff] }
 0x311   :  { %530 = vrot.lane.b32.xlu1 %v1038_v33, %s1155_s1 }
 0x315   :  { %316 = vrot.lane.b32.xlu1 %v1020_v31, %s1156_s21 }
 0x37b   :  { %v315_v35 = vpop.permute.xlu0 %314 }
 0x37c   :  { %v320_v36 = vsel %vm50_vm0, %v1266_v22, %v315_v35 }
 0x37d   :  { %1029 = vmatprep.mubr.msk.f32.mxu1 %vm328_vm2, %v320_v36 }
 0x37f   :  { %v529_v37 = vpop.permute.xlu1 %528 }
 0x380   :  { %v534_v38 = vsel %vm140_vm1, %v947_v20, %v529_v37 }
 0x381   :  { %1043 = vmatprep.mubr.msk.f32.mxu0 %vm50_vm0, %v534_v38 }
 0x383   :  { %v531_v39 = vpop.permute.xlu1 %530 }
 0x384   :  { %v535_v40 = vsel %vm140_vm1, %v948_v21, %v531_v39 }
 0x385   :  { %1044 = vmatmul.mubr.msk.f32.vlgmr.msra.gmra.mrb[6].mxu0 %vm50_vm0, %v535_v40 }
 0x386   :  { %1110 = vmatpush3.bf16.msra.mxu0 %v1087_v27  ;;  %v826_v27 = vld [vmem:[%s1385_s9 + $0x18] sm:$0xff] }
 0x387   :  { %v317_v41 = vpop.permute.xlu1 %316  ;;  %1112 = vmatprep.subr.bf16.mxu0 %v1091_v30 }
 0x388   :  { %v321_v42 = vsel %vm50_vm0, %v1258_v19, %v317_v41 }
 0x389   :  { %1030 = vmatmul.mubr.msk.f32.vlgmr.msra.gmra.mrb[2].mxu1 %vm328_vm2, %v321_v42 }
 0x38a   :  { %1050 = vmatprep.mubr.msk.f32.mxu1 %vm50_vm0, %v1230_v2  ;;  %1114 = vmatpush3.bf16.msra.mxu0 %v1091_v30  ;;  %v43_v30 = vld [vmem:[%s1383_s7 + $0x8] sm:$0xff] }
 0x458   :  { %v1045_v43 = vpop.f32.mrb[6].mxu0 }
 0x459   :  { %v614_v44 = vadd.f32 %v1045_v43, %v938_v14  ;;  %v608_v45 = vpop.f32.mrb[7].mxu0 }
 0x45a   :  { %v609_v46 = vadd.f32 %v938_v14, %v608_v45 }
 0x45b   :  { %v618_v47 = vmax.f32 %v614_v44, 0.0 }
 0x45c   :  { %v617_v48 = vmax.f32 %v609_v46, 0.0  ;;  %v1031_v49 = vpop.f32.mrb[2].mxu1 }
 0x45d   :  { %v401_v50 = vpop.f32.mrb[3].mxu1  ;;  %v407_v63 = vadd.f32 %v1031_v49, %v943_v58 }
 0x45e   :  { %v1103_v51 = vpack.c.bf16 %v618_v47, %v617_v48  ;;  %v402_v1 = vadd.f32 %v943_v58, %v401_v50 }
 0x45f   :  { %v411_v3 = vmax.f32 %v407_v63, 0.0 }
 0x460   :  { %1104 = vmatprep.subr.bf16.mxu1 %v1103_v51 }
 0x461   :  { %1106 = vmatpush3.bf16.msra.mxu1 %v1103_v51 }
 0x462   :  { %1115 = vmatprep.subr.bf16.mxu1 %v1157_v26 }
 0x464   :  { %1051 = vmatmul.mubr.msk.f32.vlgmr.msra.gmra.mrb[4].mxu1 %vm50_vm0, %v1237_v4  ;;  %v410_v4 = vmax.f32 %v402_v1, 0.0 }
 0x465   :  { %1072 = vmatprep.mubr.msk.f32.mxu1 %vm1158_vm3, %v1159_v29 }
 0x537   :  { %v1052_v52 = vpop.f32.mrb[4].mxu1 }
 0x538   :  { %698 = vrot.lane.b32.xlu1 %v1052_v52, %s1156_s21  ;;  %v685_v53 = vpop.f32.mrb[5].mxu1 }
 0x539   :  { %696 = vrot.lane.b32.xlu0 %v685_v53, %s1156_s21 }
 0x5aa   :  { %v699_v54 = vpop.permute.xlu1 %698 }
 0x5ab   :  { %v697_v55 = vpop.permute.xlu0 %696  ;;  %v703_v57 = vsel %vm50_vm0, %v618_v47, %v699_v54  ;;  %v44_v54 = vld [vmem:[%s1384_s8] sm:$0x1]  ;;  %s1160_s8 = smov [#allocation2]  }
 0x5ac   :  { %v702_v56 = vsel %vm50_vm0, %v617_v48, %v697_v55 }
 0x5ad   :  { %1061 = vmatprep.mubr.msk.f32.mxu0 %vm328_vm2, %v702_v56 }
 0x5ae   :  { %1062 = vmatmul.mubr.msk.f32.vlgmr.msra.gmra.mrb[8].mxu0 %vm328_vm2, %v703_v57 }
 0x681   :  { %v1063_v59 = vpop.f32.mrb[8].mxu0 }
 0x682   :  { %v782_v60 = vadd.f32 %v1063_v59, %v943_v58  ;;  %v776_v61 = vpop.f32.mrb[9].mxu0 }
 0x683   :  { %v777_v62 = vadd.f32 %v943_v58, %v776_v61 }
 0x684   :  { %v786_v0 = vmax.f32 %v782_v60, 0.0 }
 0x685   :  { %v785_v2 = vmax.f32 %v777_v62, 0.0 }
 0x686   :  { %791 = vrot.lane.b32.xlu1 %v786_v0, %s1156_s21  ;;  %v957_v0 = vld [vmem:[%s1386_s10] ss:$0 sm:$0xff]  ;;  %s928_s10 = sshll.u32 %s1160_s8, 4  ;;  %s929_s10 = int_to_ptr.vmem [resolvable:$true] %s928_s10 }
 0x687   :  { %789 = vrot.lane.b32.xlu0 %v785_v2, %s1156_s21  ;;  %s1131_s3 = scalar_lea.vmem %s929_s10, 32  ;;  %p1136_p1 = scmp.lt.s32.totalorder %s929_s10, %s929_s10 }
 0x688   :  { %p1132_p0 = scmp.ne.s32.totalorder %s929_s10, %s1131_s3  ;;  %p1137_p2 = scmp.lt.s32.totalorder %s1131_s3, %s1131_s3 }
 0x68a   :  { %416 = vrot.lane.b32.xlu1 %v411_v3, %s1156_s21  ;;  %p1138_p3 = por %p1137_p2, %p1136_p1 }
 0x68b   :  { %414 = vrot.lane.b32.xlu0 %v410_v4, %s1156_s21 }
 0x68c   :  { %p1139_p4 = pnand %p1138_p3, %p1132_p0 }
 0x6f8   :  { %v792_v6 = vpop.permute.xlu1 %791 }
 0x6f9   :  { %v796_v7 = vsel %vm50_vm0, %v618_v47, %v792_v6  ;;  %v790_v8 = vpop.permute.xlu0 %789 }
 0x6fa   :  { %v798_v9 = vmul.f32 %v946_v5, %v796_v7  ;;  %v795_v12 = vsel %vm50_vm0, %v617_v48, %v790_v8 }
 0x6fb   :  { %v797_v17 = vmul.f32 %v946_v5, %v795_v12 }
 0x6fc   :  { %v802_v10 = vsel %vm328_vm2, %v798_v9, 0.0  ;;  %v417_v14 = vpop.permute.xlu1 %416 }
 0x6fd   :  { %803 = vadd.xlane.f32.xlu1 %v802_v10  ;;  %v415_v11 = vpop.permute.xlu0 %414  ;;  %v421_v18 = vsel %vm50_vm0, %v1258_v19, %v417_v14  ;;  %v799_v20 = vsel %vm328_vm2, %v797_v17, 0.0  ;;  %v825_v19 = vld [vmem:[%s1385_s9 + $0x10] sm:$0xff] }
 0x6fe   :  { %v420_v13 = vsel %vm50_vm0, %v1266_v22, %v415_v11  ;;  %v429_v21 = vmul.f32 %v946_v5, %v421_v18  ;;  %v823_v22 = vld [vmem:[%s1385_s9] sm:$0xff]  ;;  %v1119_v28 = vpack.c.bf16 %v826_v27, %v825_v19 }
 0x6ff   :  { %v428_v15 = vmul.f32 %v946_v5, %v420_v13  ;;  %v1116_v25 = vpack.c.bf16 %v824_v24, %v823_v22 }
 0x700   :  { %v433_v23 = vsel %vm328_vm2, %v429_v21, 0.0 }
 0x701   :  { %v430_v16 = vsel %vm328_vm2, %v428_v15, 0.0  ;;  %1117 = vmatpush3.bf16.msra.mxu1 %v1116_v25 }
 0x702   :  { %431 = vadd.xlane.f32.xlu0 %v430_v16  ;;  %1118 = vmatprep.subr.bf16.mxu1 %v1157_v26 }
 0x705   :  { %1120 = vmatpush3.bf16.msra.mxu1 %v1119_v28 }
 0x706   :  { %800 = vadd.xlane.f32.xlu0 %v799_v20 }
 0x70a   :  { %434 = vadd.xlane.f32.xlu0 %v433_v23 }
 0x78a   :  { %v804_v31 = vpop.xlane.xlu1 %803 }
 0x78b   :  { %v806_v33 = vmul.f32 %v804_v31, %v43_v30 }
 0x78d   :  { %v808_v37 = vsel %vm328_vm2, %v806_v33, 0.0 }
 0x78f   :  { %v432_v32 = vpop.xlane.xlu0 %431 }
 0x790   :  { %v436_v38 = vmul.f32 %v432_v32, %v42_v34 }
 0x792   :  { %v438_v44 = vsel %vm328_vm2, %v436_v38, 0.0 }
 0x793   :  { %v801_v35 = vpop.xlane.xlu0 %800 }
 0x794   :  { %v805_v36 = vmul.f32 %v801_v35, %v42_v34 }
 0x796   :  { %v807_v39 = vsel %vm328_vm2, %v805_v36, 0.0 }
 0x797   :  { %v809_v40 = vadd.f32 %v808_v37, %v807_v39  ;;  %v435_v41 = vpop.xlane.xlu0 %434 }
 0x798   :  { %v437_v42 = vmul.f32 %v435_v41, %v43_v30 }
 0x799   :  { %v810_v43 = vrot.slane %v809_v40, 4 }
 0x79a   :  { %v439_v45 = vsel %vm328_vm2, %v437_v42, 0.0 }
 0x79b   :  { %v811_v46 = vadd.f32 %v810_v43, %v809_v40  ;;  %v440_v47 = vadd.f32 %v439_v45, %v438_v44 }
 0x79d   :  { %v812_v48 = vrot.slane %v811_v46, 2  ;;  %v441_v49 = vrot.slane %v440_v47, 4 }
 0x79f   :  { %v813_v50 = vadd.f32 %v812_v48, %v811_v46  ;;  %v442_v51 = vadd.f32 %v441_v49, %v440_v47 }
 0x7a1   :  { %v814_v52 = vrot.slane %v813_v50, 1  ;;  %v443_v53 = vrot.slane %v442_v51, 2 }
 0x7a3   :  { %v815_v55 = vadd.f32 %v814_v52, %v813_v50  ;;  %v444_v56 = vadd.f32 %v443_v53, %v442_v51 }
 0x7a5   :  { %v816_v57 = vadd.f32 %v815_v55, %v44_v54  ;;  %v445_v58 = vrot.slane %v444_v56, 1 }
 0x7a7   :  { %v446_v59 = vadd.f32 %v445_v58, %v444_v56  ;;  %v818_v60 = vrot.slane %v816_v57, 7 }
 0x7a9   :  { %v447_v61 = vadd.f32 %v446_v59, %v44_v54 }
 0x7ab   :  { %v821_v62 = vsel %vm820_vm4, %v447_v61, %v818_v60 }
 0x7ac   :  { %v822_v63 = vmax.f32 %v821_v62, 0.0 }
 0x7ae   :  { %1073 = vmatmul.mubr.msk.f32.vlgmr.msra.gmra.mrb[6].mxu1 %vm328_vm2, %v822_v63 }
 0x881   :  { %v903_v1 = vpop.f32.mrb[6].mxu1 }
 0x882   :  { %v904_v2 = vadd.f32 %v957_v0, %v903_v1  ;;  %v1074_v3 = vpop.f32.mrb[7].mxu1 }
 0x884   :  { %v908_v4 = vsel %vm907_vm5, %v904_v2, -inf }
 0x885   :  { %909 = vmax.xlane.f32.xlu1 %v908_v4 }
 0x912   :  { %v910_v5 = vpop.xlane.xlu1 %909 }
 0x913   :  { %v911_v6 = vsub.f32 %v904_v2, %v910_v5 }
 0x915   :  { %v912_v7 = vmul.f32 1.442695, %v911_v6 }
 0x917   :  { %1127 = vpow2.f32 %v912_v7 }
 0x921   :  { %v1128_v8 = vpop.eup %1127 }
 0x922   :  { %v914_v9 = vsel %vm907_vm5, %v1128_v8, 0.0 }
 0x923   :  { %915 = vadd.xlane.f32.xlu0 %v914_v9 }
 0x9b0   :  { %v916_v10 = vpop.xlane.xlu0 %915 }
 0x9b1   :  { %1129 = vlog2.f32 %v916_v10 }
 0x9bb   :  { %v1130_v11 = vpop.eup %1129 }
 0x9bc   :  { %v918_v12 = vmul.f32 0.6931472, %v1130_v11 }
 0x9be   :  { %v919_v13 = vadd.f32 %v918_v12, %v910_v5 }
 0x9c0   :  { %v920_v14 = vsub.f32 %v904_v2, %v919_v13 }
 0x9c2   :  { %921 = vst.msk [vmem:[#allocation2] sm:$0x3] %vm907_vm5, %v920_v14 }
 0x9c3   :  { %1142 = shalt.err (!%p1139_p4)
}
 0x9c4   :  { %s1143_s17 = scalar_lea.hbm %s1387_s11, 32 }
 0x9c5   :  { %p1144_p5 = scmp.ne.s32.totalorder %s1387_s11, %s1143_s17  ;;  %p1147_p6 = scmp.lt.u32.totalorder %s1143_s17, %s1387_s11 }
 0x9c7   :  { %p1149_p7 = pnand %p1147_p6, %p1144_p5 }
 0x9c9   :  { %1152 = shalt.err (!%p1149_p7)
}
 0x9ca   :  { %931 = dma.vmem_to_hbm [thread:$0]  %s929_s10, 32, %s1387_s11, [#allocation3]  }
 0x9cb   :  { %1153 = dma.done.wait [#allocation3], 32  }
 0x9cc   :  { %1154 = vsyncadd [#allocation3], 4294967264 }
 0x9cd   :  { %935 = vsyncpa [#allocation3], 1 }

</bundles_post_ra>
